<compile_context>
chip_gen: v6e
topology: v6e:2x2x1
jax: 0.10.0
libtpu: 0.0.40
codegen_flags: <defaults>
</compile_context>

<pallas_src>
import functools
import math

import jax
import jax.numpy as jnp
import numpy as np
from jax.experimental import pallas as pl
from jax.experimental.pallas import tpu as pltpu

# Module-consistent shapes.
Z_DIM = 32
HIDDEN_DIM = 64
OUT_DIM = 16
OUT_PAD = 128          # lane-dense output width (multiple of 128)
BATCH = 16

MAX_TILE_B = 1024      # fat batch tiles: step overhead amortized; VMEM trivial
SPLIT_MIN_B = 512      # if B >= this, force >= 2 grid steps (v7x: 2 TensorCores)
BF16_MIN_B = 512       # bf16 MXU operands only once throughput actually matters


def _round_up(x, m):
    return ((x + m - 1) // m) * m


def _leaky_relu(x, slope=0.2):
    # Valid for slope in (0, 1); one vmul + vmax instead of vcmp + vsel.
    return jnp.maximum(x, slope * x)


def mapping_kernel(z_ref,
                   w0_ref, b0_ref,
                   w1_ref, b1_ref,
                   w2_ref, b2_ref,
                   wo_ref, bo_ref,
                   out_ref, *, mxu_dtype):
    """Fused 4-layer MLP for one batch tile; all operands resident in VMEM.

    z arrives f32 and is cast to the MXU dtype inside the kernel (VPU cast,
    hidden under DMA/MXU slack).  Accumulation is always f32
    (preferred_element_type); bias add + leaky_relu run in f32 on the VPU.
    """
    h = jnp.dot(z_ref[...].astype(mxu_dtype), w0_ref[...],
                preferred_element_type=jnp.float32) + b0_ref[...]
    h = _leaky_relu(h)
    h = jnp.dot(h.astype(mxu_dtype), w1_ref[...],
                preferred_element_type=jnp.float32) + b1_ref[...]
    h = _leaky_relu(h)
    h = jnp.dot(h.astype(mxu_dtype), w2_ref[...],
                preferred_element_type=jnp.float32) + b2_ref[...]
    h = _leaky_relu(h)
    out_ref[...] = (jnp.dot(h.astype(mxu_dtype), wo_ref[...],
                            preferred_element_type=jnp.float32) + bo_ref[...])


def mapping_network(z, params):
    """params = [(w0,b0),(w1,b1),(w2,b2),(wo,bo)] with w: (in,out), b: (1,out)."""
    B = z.shape[0]
    (w0, b0), (w1, b1), (w2, b2), (wo, bo) = params

    # Precision policy: f32 operands at small batch (launch-bound; bf16 buys
    # nothing and costs accuracy), bf16 operands at production batch sizes.
    use_bf16 = B >= BF16_MIN_B
    mxu_dtype = jnp.bfloat16 if use_bf16 else jnp.float32

    # --- batch tiling -------------------------------------------------------
    if B >= SPLIT_MIN_B:
        # At least 2 grid steps so v7x can shard the batch axis across its
        # 2 TensorCores; tiles capped at MAX_TILE_B and rounded to sublanes.
        tile_b = min(MAX_TILE_B, _round_up(pl.cdiv(B, 2), 8))
    else:
        tile_b = B  # single grid step; block == full array (layout-legal)
    B_pad = _round_up(B, tile_b)
    num_tiles = B_pad // tile_b
    if B_pad != B:
        z = jnp.pad(z, ((0, B_pad - B), (0, 0)))

    # --- lane-dense output: zero-pad the output layer to OUT_PAD lanes ------
    wo_p = jnp.pad(wo, ((0, 0), (0, OUT_PAD - OUT_DIM)))
    bo_p = jnp.pad(bo, ((0, 0), (0, OUT_PAD - OUT_DIM)))

    # Weights in the MXU dtype (tiny, cast once); biases stay f32.
    w0m, w1m, w2m, wom = (w.astype(mxu_dtype) for w in (w0, w1, w2, wo_p))

    def const_spec(shape):
        # Weight / bias blocks: same full block at every grid step (DMA'd once).
        return pl.BlockSpec(shape, lambda i: (0, 0))

    itemsize = 2 if use_bf16 else 4
    flops = 2 * B_pad * (Z_DIM * HIDDEN_DIM
                         + 2 * HIDDEN_DIM * HIDDEN_DIM
                         + HIDDEN_DIM * OUT_PAD)
    bytes_accessed = (
        B_pad * Z_DIM * 4                                        # z streamed f32
        + (w0.size + w1.size + w2.size + wo_p.size) * itemsize   # weights
        + (b0.size + b1.size + b2.size + bo_p.size) * 4          # biases f32
        + B_pad * OUT_PAD * 4)                                   # padded output

    out_padded = pl.pallas_call(
        functools.partial(mapping_kernel, mxu_dtype=mxu_dtype),
        out_shape=jax.ShapeDtypeStruct((B_pad, OUT_PAD), jnp.float32),
        grid_spec=pltpu.PrefetchScalarGridSpec(
            num_scalar_prefetch=0,
            grid=(num_tiles,),
            in_specs=[
                pl.BlockSpec((tile_b, Z_DIM), lambda i: (i, 0)),   # z tile (f32)
                const_spec(w0.shape), const_spec(b0.shape),
                const_spec(w1.shape), const_spec(b1.shape),
                const_spec(w2.shape), const_spec(b2.shape),
                const_spec(wo_p.shape), const_spec(bo_p.shape),
            ],
            out_specs=pl.BlockSpec((tile_b, OUT_PAD), lambda i: (i, 0)),
        ),
        compiler_params=pltpu.CompilerParams(
            dimension_semantics=(("parallel",) if num_tiles > 1
                                 else ("arbitrary",))),
        cost_estimate=pl.CostEstimate(flops=flops, transcendentals=0,
                                      bytes_accessed=bytes_accessed),
    )(z, w0m, b0, w1m, b1, w2m, b2, wom, bo_p)

    # Drop batch padding and the zero-padded lanes.
    return out_padded[:B, :OUT_DIM]


def init_params(key):
    """Deterministic synthetic init mirroring the PyTorch module's __init__."""
    keys = jax.random.split(key, 8)
    a = 0.2
    gain = math.sqrt(2.0 / (1.0 + a * a))  # kaiming leaky_relu gain

    def kaiming_linear(kw, kb, fan_in, fan_out):
        std = gain / math.sqrt(fan_in)
        w = jax.random.normal(kw, (fan_in, fan_out), jnp.float32) * std  # (in,out) = W.T
        bound = 1.0 / math.sqrt(fan_in)
        b = jax.random.uniform(kb, (1, fan_out), jnp.float32, -bound, bound)
        return w, b

    p0 = kaiming_linear(keys[0], keys[1], Z_DIM, HIDDEN_DIM)
    p1 = kaiming_linear(keys[2], keys[3], HIDDEN_DIM, HIDDEN_DIM)
    p2 = kaiming_linear(keys[4], keys[5], HIDDEN_DIM, HIDDEN_DIM)

    # Output layer: default-ish linear init, then weight *= 0.25 (as in __init__).
    bound_o = 1.0 / math.sqrt(HIDDEN_DIM)
    wo = jax.random.uniform(keys[6], (HIDDEN_DIM, OUT_DIM), jnp.float32,
                            -bound_o, bound_o) * 0.25
    bo = jax.random.uniform(keys[7], (1, OUT_DIM), jnp.float32, -bound_o, bound_o)
    return [p0, p1, p2, (wo, bo)]


def ref_forward(z, params):
    """Pure-JAX f32 reference matching the PyTorch forward."""
    h = z
    for (w, b) in params[:-1]:
        h = _leaky_relu(h @ w + b)
    wo, bo = params[-1]
    return h @ wo + bo


if __name__ == "__main__":
    key = jax.random.PRNGKey(0)
    kz, kp = jax.random.split(key)
    z = jax.random.normal(kz, (BATCH, Z_DIM), jnp.float32)
    params = init_params(kp)

    out = mapping_network(z, params)
    out = jax.block_until_ready(out)

    ref = ref_forward(z, params)
    # At B=16 the kernel runs with f32 MXU operands, so the tolerance is tight.
    np.testing.assert_allclose(np.asarray(out), np.asarray(ref),
                               rtol=1e-3, atol=1e-3)
    assert out.shape == (BATCH, OUT_DIM)
    print("KERNEL_OK")
</pallas_src>

<mosaic_0001>
module attributes {stable_mosaic.version = 11 : i64} {
  func.func @mapping_kernel(%arg0: i32, %arg1: memref<16x32xf32, #tpu.memory_space<vmem>>, %arg2: memref<32x64xf32, #tpu.memory_space<vmem>>, %arg3: memref<1x64xf32, #tpu.memory_space<vmem>>, %arg4: memref<64x64xf32, #tpu.memory_space<vmem>>, %arg5: memref<1x64xf32, #tpu.memory_space<vmem>>, %arg6: memref<64x64xf32, #tpu.memory_space<vmem>>, %arg7: memref<1x64xf32, #tpu.memory_space<vmem>>, %arg8: memref<64x128xf32, #tpu.memory_space<vmem>>, %arg9: memref<1x128xf32, #tpu.memory_space<vmem>>, %arg10: memref<16x128xf32, #tpu.memory_space<vmem>>) attributes {dimension_semantics = [#tpu.dimension_semantics<arbitrary>], iteration_bounds = array<i64: 1>, scalar_prefetch = 0 : i64, scratch_operands = 0 : i64, tpu.core_type = #tpu.core_type<tc>, window_params = [{transform_indices = @transform_0, window_bounds = array<i64: 16, 32>}, {pipeline_mode = #tpu.pipeline_mode<synchronous>, transform_indices = @transform_1, window_bounds = array<i64: 32, 64>}, {pipeline_mode = #tpu.pipeline_mode<synchronous>, transform_indices = @transform_2, window_bounds = array<i64: 1, 64>}, {pipeline_mode = #tpu.pipeline_mode<synchronous>, transform_indices = @transform_3, window_bounds = array<i64: 64, 64>}, {pipeline_mode = #tpu.pipeline_mode<synchronous>, transform_indices = @transform_4, window_bounds = array<i64: 1, 64>}, {pipeline_mode = #tpu.pipeline_mode<synchronous>, transform_indices = @transform_5, window_bounds = array<i64: 64, 64>}, {pipeline_mode = #tpu.pipeline_mode<synchronous>, transform_indices = @transform_6, window_bounds = array<i64: 1, 64>}, {pipeline_mode = #tpu.pipeline_mode<synchronous>, transform_indices = @transform_7, window_bounds = array<i64: 64, 128>}, {pipeline_mode = #tpu.pipeline_mode<synchronous>, transform_indices = @transform_8, window_bounds = array<i64: 1, 128>}, {transform_indices = @transform_9, window_bounds = array<i64: 16, 128>}]} {
    %c0 = arith.constant 0 : index
    %c0_0 = arith.constant 0 : index
    %0 = vector.load %arg1[%c0, %c0_0] : memref<16x32xf32, #tpu.memory_space<vmem>>, vector<16x32xf32>
    %c0_1 = arith.constant 0 : index
    %c0_2 = arith.constant 0 : index
    %1 = vector.load %arg2[%c0_1, %c0_2] : memref<32x64xf32, #tpu.memory_space<vmem>>, vector<32x64xf32>
    %cst = arith.constant dense<0.000000e+00> : vector<16x64xf32>
    %2 = tpu.matmul %0, %1, %cst {dimension_numbers = #tpu.dot_dimension_numbers<[1], [0], [0], [1], [0, 0, 1, 1], [], []>} : vector<16x32xf32>, vector<32x64xf32>, vector<16x64xf32> -> vector<16x64xf32>
    %c0_3 = arith.constant 0 : index
    %c0_4 = arith.constant 0 : index
    %3 = vector.load %arg3[%c0_3, %c0_4] : memref<1x64xf32, #tpu.memory_space<vmem>>, vector<1x64xf32>
    %4 = vector.broadcast %3 : vector<1x64xf32> to vector<16x64xf32>
    %5 = arith.addf %2, %4 : vector<16x64xf32>
    %cst_5 = arith.constant 2.000000e-01 : f32
    %6 = vector.broadcast %cst_5 : f32 to vector<16x64xf32>
    %7 = arith.mulf %6, %5 : vector<16x64xf32>
    %8 = arith.maximumf %5, %7 : vector<16x64xf32>
    %c0_6 = arith.constant 0 : index
    %c0_7 = arith.constant 0 : index
    %9 = vector.load %arg4[%c0_6, %c0_7] : memref<64x64xf32, #tpu.memory_space<vmem>>, vector<64x64xf32>
    %cst_8 = arith.constant dense<0.000000e+00> : vector<16x64xf32>
    %10 = tpu.matmul %8, %9, %cst_8 {dimension_numbers = #tpu.dot_dimension_numbers<[1], [0], [0], [1], [0, 0, 1, 1], [], []>} : vector<16x64xf32>, vector<64x64xf32>, vector<16x64xf32> -> vector<16x64xf32>
    %c0_9 = arith.constant 0 : index
    %c0_10 = arith.constant 0 : index
    %11 = vector.load %arg5[%c0_9, %c0_10] : memref<1x64xf32, #tpu.memory_space<vmem>>, vector<1x64xf32>
    %12 = vector.broadcast %11 : vector<1x64xf32> to vector<16x64xf32>
    %13 = arith.addf %10, %12 : vector<16x64xf32>
    %cst_11 = arith.constant 2.000000e-01 : f32
    %14 = vector.broadcast %cst_11 : f32 to vector<16x64xf32>
    %15 = arith.mulf %14, %13 : vector<16x64xf32>
    %16 = arith.maximumf %13, %15 : vector<16x64xf32>
    %c0_12 = arith.constant 0 : index
    %c0_13 = arith.constant 0 : index
    %17 = vector.load %arg6[%c0_12, %c0_13] : memref<64x64xf32, #tpu.memory_space<vmem>>, vector<64x64xf32>
    %cst_14 = arith.constant dense<0.000000e+00> : vector<16x64xf32>
    %18 = tpu.matmul %16, %17, %cst_14 {dimension_numbers = #tpu.dot_dimension_numbers<[1], [0], [0], [1], [0, 0, 1, 1], [], []>} : vector<16x64xf32>, vector<64x64xf32>, vector<16x64xf32> -> vector<16x64xf32>
    %c0_15 = arith.constant 0 : index
    %c0_16 = arith.constant 0 : index
    %19 = vector.load %arg7[%c0_15, %c0_16] : memref<1x64xf32, #tpu.memory_space<vmem>>, vector<1x64xf32>
    %20 = vector.broadcast %19 : vector<1x64xf32> to vector<16x64xf32>
    %21 = arith.addf %18, %20 : vector<16x64xf32>
    %cst_17 = arith.constant 2.000000e-01 : f32
    %22 = vector.broadcast %cst_17 : f32 to vector<16x64xf32>
    %23 = arith.mulf %22, %21 : vector<16x64xf32>
    %24 = arith.maximumf %21, %23 : vector<16x64xf32>
    %c0_18 = arith.constant 0 : index
    %c0_19 = arith.constant 0 : index
    %25 = vector.load %arg8[%c0_18, %c0_19] : memref<64x128xf32, #tpu.memory_space<vmem>>, vector<64x128xf32>
    %cst_20 = arith.constant dense<0.000000e+00> : vector<16x128xf32>
    %26 = tpu.matmul %24, %25, %cst_20 {dimension_numbers = #tpu.dot_dimension_numbers<[1], [0], [0], [1], [0, 0, 1, 1], [], []>} : vector<16x64xf32>, vector<64x128xf32>, vector<16x128xf32> -> vector<16x128xf32>
    %c0_21 = arith.constant 0 : index
    %c0_22 = arith.constant 0 : index
    %27 = vector.load %arg9[%c0_21, %c0_22] : memref<1x128xf32, #tpu.memory_space<vmem>>, vector<1x128xf32>
    %28 = vector.broadcast %27 : vector<1x128xf32> to vector<16x128xf32>
    %29 = arith.addf %26, %28 : vector<16x128xf32>
    %c0_23 = arith.constant 0 : index
    %c0_24 = arith.constant 0 : index
    %30 = vector.load %arg10[%c0_23, %c0_24] : memref<16x128xf32, #tpu.memory_space<vmem>>, vector<16x128xf32>
    tpu.vector_store %arg10[%c0_23, %c0_24], %29 {strides = array<i32>} : memref<16x128xf32, #tpu.memory_space<vmem>>, vector<16x128xf32>,
    return
  }
  func.func @transform_0(%arg0: i32) -> (i32, i32) {
    %c0_i32 = arith.constant 0 : i32
    %c0_i32_0 = arith.constant 0 : i32
    return %arg0, %c0_i32 : i32, i32
  }
  func.func @transform_1(%arg0: i32) -> (i32, i32) {
    %c0_i32 = arith.constant 0 : i32
    %c0_i32_0 = arith.constant 0 : i32
    %c0_i32_1 = arith.constant 0 : i32
    return %c0_i32, %c0_i32_0 : i32, i32
  }
  func.func @transform_2(%arg0: i32) -> (i32, i32) {
    %c0_i32 = arith.constant 0 : i32
    %c0_i32_0 = arith.constant 0 : i32
    %c0_i32_1 = arith.constant 0 : i32
    return %c0_i32, %c0_i32_0 : i32, i32
  }
  func.func @transform_3(%arg0: i32) -> (i32, i32) {
    %c0_i32 = arith.constant 0 : i32
    %c0_i32_0 = arith.constant 0 : i32
    %c0_i32_1 = arith.constant 0 : i32
    return %c0_i32, %c0_i32_0 : i32, i32
  }
  func.func @transform_4(%arg0: i32) -> (i32, i32) {
    %c0_i32 = arith.constant 0 : i32
    %c0_i32_0 = arith.constant 0 : i32
    %c0_i32_1 = arith.constant 0 : i32
    return %c0_i32, %c0_i32_0 : i32, i32
  }
  func.func @transform_5(%arg0: i32) -> (i32, i32) {
    %c0_i32 = arith.constant 0 : i32
    %c0_i32_0 = arith.constant 0 : i32
    %c0_i32_1 = arith.constant 0 : i32
    return %c0_i32, %c0_i32_0 : i32, i32
  }
  func.func @transform_6(%arg0: i32) -> (i32, i32) {
    %c0_i32 = arith.constant 0 : i32
    %c0_i32_0 = arith.constant 0 : i32
    %c0_i32_1 = arith.constant 0 : i32
    return %c0_i32, %c0_i32_0 : i32, i32
  }
  func.func @transform_7(%arg0: i32) -> (i32, i32) {
    %c0_i32 = arith.constant 0 : i32
    %c0_i32_0 = arith.constant 0 : i32
    %c0_i32_1 = arith.constant 0 : i32
    return %c0_i32, %c0_i32_0 : i32, i32
  }
  func.func @transform_8(%arg0: i32) -> (i32, i32) {
    %c0_i32 = arith.constant 0 : i32
    %c0_i32_0 = arith.constant 0 : i32
    %c0_i32_1 = arith.constant 0 : i32
    return %c0_i32, %c0_i32_0 : i32, i32
  }
  func.func @transform_9(%arg0: i32) -> (i32, i32) {
    %c0_i32 = arith.constant 0 : i32
    %c0_i32_0 = arith.constant 0 : i32
    return %arg0, %c0_i32 : i32, i32
  }
}

</mosaic_0001>

<bundles_post_ra>
// kernel: tpu_custom_call.1
= control target key start
LH: loop header
LB: loop body
LE: loop exit
PB: predicated region body
PF: predicated region fallthrough
CT: control target
= control target key end

     0   :  { %14 = vsyncpa [#allocation3], 0  ;;  %s884_s0 = inlined_call_operand.hbm [shape: f32[16,32], index: 0, kind: input, shape index: {}]   ;;  %s885_s1 = inlined_call_operand.hbm [shape: f32[32,64], index: 1, kind: input, shape index: {}]   ;;  %s886_s2 = inlined_call_operand.vmem [shape: f32[1,64], index: 2, kind: input, shape index: {}]   ;;  %s887_s3 = inlined_call_operand.hbm [shape: f32[64,64], index: 3, kind: input, shape index: {}]   ;;  %s888_s4 = inlined_call_operand.vmem [shape: f32[1,64], index: 4, kind: input, shape index: {}]   ;;  %s889_s5 = inlined_call_operand.hbm [shape: f32[64,64], index: 5, kind: input, shape index: {}]   ;;  %s890_s6 = inlined_call_operand.vmem [shape: f32[1,64], index: 6, kind: input, shape index: {}]   ;;  %s891_s7 = inlined_call_operand.hbm [shape: f32[64,128], index: 7, kind: input, shape index: {}]   ;;  %s892_s8 = inlined_call_operand.vmem [shape: f32[1,128], index: 8, kind: input, shape index: {}]   ;;  %s893_s9 = inlined_call_operand.hbm [shape: f32[16,128], index: 9, kind: output, shape index: {}]  }
   0x1   :  { %15 = vsyncpa [#allocation6], 0 }
   0x2   :  { %16 = vsyncpa [#allocation9], 0 }
   0x3   :  { %17 = vsyncpa [#allocation4], 0  ;;  %s770_s30 = smov [#allocation5]   ;;  %s771_s11 = smov [#allocation8]  }
   0x4   :  { %s35_s10 = sshll.u32 %s770_s30, 4  ;;  %s63_s12 = sshll.u32 %s771_s11, 4  ;;  %s36_s10 = int_to_ptr.vmem [resolvable:$true] %s35_s10  ;;  %s64_s12 = int_to_ptr.vmem [resolvable:$true] %s63_s12 }
   0x5   :  { %s650_s13 = scalar_lea.vmem %s36_s10, 512  ;;  %p655_p1 = scmp.lt.s32.totalorder %s36_s10, %s36_s10 }
   0x6   :  { %p651_p0 = scmp.ne.s32.totalorder %s36_s10, %s650_s13  ;;  %p656_p2 = scmp.lt.s32.totalorder %s650_s13, %s650_s13 }
   0x8   :  { %p657_p3 = por %p656_p2, %p655_p1 }
   0xa   :  { %p658_p4 = pnand %p657_p3, %p651_p0 }
   0xc   :  { %661 = shalt.err (!%p658_p4)
}
   0xd   :  { %s772_s14 = smov 128   ;;  %s773_s15 = smov 8  }
   0xe   :  { %41 = dma.hbm_to_vmem [thread:$0]  %s885_s1, 512, %s36_s10, [#allocation6], %s772_s14, %s772_s14, %s773_s15  }
   0xf   :  { %s670_s18 = scalar_lea.vmem %s64_s12, 1024  ;;  %p675_p6 = scmp.lt.s32.totalorder %s64_s12, %s64_s12 }
  0x10   :  { %p671_p5 = scmp.ne.s32.totalorder %s64_s12, %s670_s18  ;;  %p676_p7 = scmp.lt.s32.totalorder %s670_s18, %s670_s18 }
  0x12   :  { %p677_p8 = por %p676_p7, %p675_p6 }
  0x14   :  { %p678_p9 = pnand %p677_p8, %p671_p5 }
  0x16   :  { %681 = shalt.err (!%p678_p9)
}
  0x17   :  { %69 = dma.hbm_to_vmem [thread:$0]  %s889_s5, 1024, %s64_s12, [#allocation9], %s772_s14, %s772_s14, %s773_s15  }
  0x18   :  { %s774_s21 = smov [#allocation2]   ;;  %s775_s23 = smov [#allocation7]  }
  0x19   :  { %s23_s22 = sshll.u32 %s774_s21, 4  ;;  %s49_s24 = sshll.u32 %s775_s23, 4  ;;  %s24_s22 = int_to_ptr.vmem [resolvable:$true] %s23_s22  ;;  %s50_s24 = int_to_ptr.vmem [resolvable:$true] %s49_s24 }
  0x1a   :  { %s690_s1 = scalar_lea.vmem %s24_s22, 256  ;;  %p695_p11 = scmp.lt.s32.totalorder %s24_s22, %s24_s22 }
  0x1b   :  { %p691_p10 = scmp.ne.s32.totalorder %s24_s22, %s690_s1  ;;  %p696_p12 = scmp.lt.s32.totalorder %s690_s1, %s690_s1 }
  0x1d   :  { %p697_p13 = por %p696_p12, %p695_p11 }
  0x1f   :  { %p698_p0 = pnand %p697_p13, %p691_p10 }
  0x21   :  { %701 = shalt.err (!%p698_p0)
}
  0x22   :  { %29 = dma.hbm_to_vmem [thread:$0]  %s884_s0, 256, %s24_s22, [#allocation3], %s772_s14, %s772_s14, %s773_s15  }
  0x23   :  { %s710_s5 = scalar_lea.vmem %s50_s24, 1024  ;;  %p715_p2 = scmp.lt.s32.totalorder %s50_s24, %s50_s24 }
  0x24   :  { %p711_p1 = scmp.ne.s32.totalorder %s50_s24, %s710_s5  ;;  %p716_p3 = scmp.lt.s32.totalorder %s710_s5, %s710_s5 }
  0x26   :  { %p717_p4 = por %p716_p3, %p715_p2 }
  0x28   :  { %p718_p5 = pnand %p717_p4, %p711_p1 }
  0x2a   :  { %721 = shalt.err (!%p718_p5)
}
  0x2b   :  { %55 = dma.hbm_to_vmem [thread:$0]  %s887_s3, 1024, %s50_s24, [#allocation6], %s772_s14, %s772_s14, %s773_s15  }
  0x2c   :  { %s776_s29 = smov [#allocation10]  }
  0x2d   :  { %s77_s30 = sshll.u32 %s776_s29, 4  ;;  %s78_s30 = int_to_ptr.vmem [resolvable:$true] %s77_s30 }
  0x2e   :  { %s730_s10 = scalar_lea.vmem %s78_s30, 1024  ;;  %p735_p7 = scmp.lt.s32.totalorder %s78_s30, %s78_s30 }
  0x2f   :  { %p731_p6 = scmp.ne.s32.totalorder %s78_s30, %s730_s10  ;;  %p736_p8 = scmp.lt.s32.totalorder %s730_s10, %s730_s10 }
  0x31   :  { %p737_p9 = por %p736_p8, %p735_p7 }
  0x33   :  { %p738_p10 = pnand %p737_p9, %p731_p6 }
  0x35   :  { %741 = shalt.err (!%p738_p10)
}
  0x36   :  { %83 = dma.hbm_to_vmem [thread:$0]  %s891_s7, 1024, %s78_s30, [#allocation9], %s772_s14, %s772_s14, %s773_s15  }
  0x37   :  { %762 = dma.done.wait [#allocation3], 256  }
  0x38   :  { %763 = vsyncadd [#allocation3], 4294967040 }
  0x39   :  { %764 = dma.done.wait [#allocation6], 1536  }
  0x3a   :  { %765 = vsyncadd [#allocation6], 4294965760 }
  0x3b   :  { %766 = dma.done.wait [#allocation9], 2048  }
  0x3c   :  { %767 = vsyncadd [#allocation9], 4294965248  ;;  %vm114_vm0 = vcmask 261120   ;;  %v106_v0 = vld [vmem:[#allocation5 + $0x18] sm:$0xff]  ;;  %v105_v1 = vld [vmem:[#allocation5 + $0x10] sm:$0xff]  ;;  %vm215_vm1 = vcmask 523264  }
  0x3d   :  { %566 = vmatprep.subr.mxu0 %v106_v0  ;;  %v101_v2 = vld [vmem:[#allocation2] sm:$0xff]  ;;  %v104_v3 = vld [vmem:[#allocation5 + $0x8] sm:$0xff]  ;;  %v207_v4 = vld [vmem:[#allocation7 + $0x38] sm:$0xff]  ;;  %s777_s18 = smov [#allocation11]  }
  0x3e   :  { %567 = vmatpush3.msra.mxu0 %v106_v0  ;;  %574 = vmatprep.mubr.msk.f32.mxu0 %vm114_vm0, %v101_v2  ;;  %v206_v5 = vld [vmem:[#allocation7 + $0x30] sm:$0xff]  ;;  %v103_v6 = vld [vmem:[#allocation5] sm:$0xff]  ;;  %v205_v7 = vld [vmem:[#allocation7 + $0x28] sm:$0xff]  ;;  %s504_s19 = sshll.u32 %s777_s18, 4  ;;  %s505_s19 = int_to_ptr.vmem [resolvable:$true] %s504_s19 }
  0x3f   :  { %568 = vmatprep.subr.mxu0 %v105_v1  ;;  %577 = vmatprep.subr.mxu1 %v207_v4  ;;  %v102_v8 = vld [vmem:[#allocation2 + $0x8] sm:$0xff]  ;;  %v204_v9 = vld [vmem:[#allocation7 + $0x20] sm:$0xff]  ;;  %v202_v11 = vld [vmem:[#allocation7 + $0x10] sm:$0xff]  ;;  %p747_p12 = scmp.lt.s32.totalorder %s505_s19, %s505_s19 }
  0x40   :  { %569 = vmatpush3.msra.mxu0 %v105_v1  ;;  %578 = vmatpush3.msra.mxu1 %v207_v4  ;;  %v203_v10 = vld [vmem:[#allocation7 + $0x18] sm:$0xff]  ;;  %v201_v12 = vld [vmem:[#allocation7 + $0x8] sm:$0xff]  ;;  %v200_v13 = vld [vmem:[#allocation7] sm:$0xff] }
  0x41   :  { %570 = vmatprep.subr.mxu0 %v104_v3  ;;  %579 = vmatprep.subr.mxu1 %v206_v5  ;;  %v308_v14 = vld [vmem:[#allocation8 + $0x38] sm:$0xff]  ;;  %v307_v15 = vld [vmem:[#allocation8 + $0x30] sm:$0xff]  ;;  %v306_v16 = vld [vmem:[#allocation8 + $0x28] sm:$0xff] }
  0x42   :  { %571 = vmatpush3.msra.mxu0 %v104_v3  ;;  %580 = vmatpush3.msra.mxu1 %v206_v5  ;;  %v518_v17 = vld [vmem:[%s886_s2] ss:$0 sm:$0xff]  ;;  %v305_v26 = vld [vmem:[#allocation8 + $0x20] sm:$0xff]  ;;  %v304_v27 = vld [vmem:[#allocation8 + $0x18] sm:$0xff] }
  0x43   :  { %572 = vmatprep.subr.mxu0 %v103_v6  ;;  %581 = vmatprep.subr.mxu1 %v205_v7  ;;  %v303_v28 = vld [vmem:[#allocation8 + $0x10] sm:$0xff]  ;;  %v302_v29 = vld [vmem:[#allocation8 + $0x8] sm:$0xff]  ;;  %v301_v30 = vld [vmem:[#allocation8] sm:$0xff] }
  0x44   :  { %573 = vmatpush3.msra.mxu0 %v103_v6  ;;  %582 = vmatpush3.msra.mxu1 %v205_v7  ;;  %v408_v31 = vld [vmem:[#allocation10 + $0x38] sm:$0xff]  ;;  %v407_v32 = vld [vmem:[#allocation10 + $0x30] sm:$0xff]  ;;  %v406_v33 = vld [vmem:[#allocation10 + $0x28] sm:$0xff] }
  0x45   :  { %575 = vmatmul.mubr.msk.f32.vlgmr.msra.gmra.mxu0 %vm114_vm0, %v102_v8  ;;  %583 = vmatprep.subr.mxu1 %v204_v9  ;;  %v521_v34 = vld [vmem:[%s888_s4] ss:$0 sm:$0xff]  ;;  %v405_v43 = vld [vmem:[#allocation10 + $0x20] sm:$0xff]  ;;  %v404_v44 = vld [vmem:[#allocation10 + $0x18] sm:$0xff] }
  0x46   :  { %584 = vmatpush3.msra.mxu1 %v204_v9  ;;  %596 = vmatprep.subr.mxu0 %v308_v14  ;;  %v403_v45 = vld [vmem:[#allocation10 + $0x10] sm:$0xff]  ;;  %v402_v46 = vld [vmem:[#allocation10 + $0x8] sm:$0xff]  ;;  %v401_v47 = vld [vmem:[#allocation10] sm:$0xff] }
  0x47   :  { %585 = vmatprep.subr.mxu1 %v203_v10  ;;  %597 = vmatpush3.msra.mxu0 %v308_v14  ;;  %v524_v48 = vld [vmem:[%s890_s6] ss:$0 sm:$0xff]  ;;  %s742_s6 = scalar_lea.vmem %s505_s19, 256 }
  0x48   :  { %586 = vmatpush3.msra.mxu1 %v203_v10  ;;  %598 = vmatprep.subr.mxu0 %v307_v15  ;;  %v527_v57 = vld [vmem:[%s892_s8] ss:$0 sm:$0xff]  ;;  %p743_p11 = scmp.ne.s32.totalorder %s505_s19, %s742_s6  ;;  %p748_p13 = scmp.lt.s32.totalorder %s742_s6, %s742_s6 }
  0x49   :  { %587 = vmatprep.subr.mxu1 %v202_v11  ;;  %599 = vmatpush3.msra.mxu0 %v307_v15 }
  0x4a   :  { %588 = vmatpush3.msra.mxu1 %v202_v11  ;;  %600 = vmatprep.subr.mxu0 %v306_v16  ;;  %p749_p0 = por %p748_p13, %p747_p12 }
  0x4b   :  { %589 = vmatprep.subr.mxu1 %v201_v12  ;;  %601 = vmatpush3.msra.mxu0 %v306_v16 }
  0x4c   :  { %590 = vmatpush3.msra.mxu1 %v201_v12  ;;  %602 = vmatprep.subr.mxu0 %v305_v26  ;;  %p750_p1 = pnand %p749_p0, %p743_p11 }
  0x4d   :  { %591 = vmatprep.subr.mxu1 %v200_v13  ;;  %603 = vmatpush3.msra.mxu0 %v305_v26 }
  0x4e   :  { %592 = vmatpush3.msra.mxu1 %v200_v13  ;;  %604 = vmatprep.subr.mxu0 %v304_v27 }
  0x4f   :  { %605 = vmatpush3.msra.mxu0 %v304_v27  ;;  %615 = vmatprep.subr.mxu1 %v408_v31 }
  0x50   :  { %606 = vmatprep.subr.mxu0 %v303_v28 }
  0x51   :  { %607 = vmatpush3.msra.mxu0 %v303_v28 }
  0x52   :  { %608 = vmatprep.subr.mxu0 %v302_v29 }
  0x53   :  { %609 = vmatpush3.msra.mxu0 %v302_v29 }
  0x54   :  { %610 = vmatprep.subr.mxu0 %v301_v30 }
  0x55   :  { %611 = vmatpush3.msra.mxu0 %v301_v30 }
 0x105   :  { %v576_v18 = vpop.f32.mrf.mxu0 }
 0x106   :  { %v193_v19 = vadd.f32 %v576_v18, %v518_v17 }
 0x107   :  { %v187_v20 = vpop.f32.mrf.mxu0 }
 0x108   :  { %v188_v21 = vadd.f32 %v518_v17, %v187_v20  ;;  %v197_v22 = vmul.f32 0.2, %v193_v19 }
 0x10a   :  { %v196_v23 = vmul.f32 0.2, %v188_v21  ;;  %v199_v25 = vmax.f32 %v193_v19, %v197_v22 }
 0x10c   :  { %v198_v24 = vmax.f32 %v188_v21, %v196_v23 }
 0x10e   :  { %593 = vmatprep.mubr.msk.f32.mxu1 %vm215_vm1, %v198_v24 }
 0x10f   :  { %594 = vmatmul.mubr.msk.f32.vlgmr.msra.gmra.mxu1 %vm215_vm1, %v199_v25 }
 0x110   :  { %616 = vmatpush3.msra.mxu1 %v408_v31 }
 0x111   :  { %617 = vmatprep.subr.mxu1 %v407_v32 }
 0x112   :  { %618 = vmatpush3.msra.mxu1 %v407_v32 }
 0x113   :  { %619 = vmatprep.subr.mxu1 %v406_v33 }
 0x114   :  { %620 = vmatpush3.msra.mxu1 %v406_v33 }
 0x115   :  { %621 = vmatprep.subr.mxu1 %v405_v43 }
 0x116   :  { %622 = vmatpush3.msra.mxu1 %v405_v43 }
 0x117   :  { %623 = vmatprep.subr.mxu1 %v404_v44 }
 0x118   :  { %624 = vmatpush3.msra.mxu1 %v404_v44 }
 0x119   :  { %625 = vmatprep.subr.mxu1 %v403_v45 }
 0x11a   :  { %626 = vmatpush3.msra.mxu1 %v403_v45 }
 0x11b   :  { %627 = vmatprep.subr.mxu1 %v402_v46 }
 0x11c   :  { %628 = vmatpush3.msra.mxu1 %v402_v46 }
 0x11d   :  { %629 = vmatprep.subr.mxu1 %v401_v47 }
 0x11e   :  { %630 = vmatpush3.msra.mxu1 %v401_v47 }
 0x1cf   :  { %v595_v35 = vpop.f32.mrf.mxu1 }
 0x1d0   :  { %v294_v36 = vadd.f32 %v595_v35, %v521_v34 }
 0x1d1   :  { %v288_v37 = vpop.f32.mrf.mxu1 }
 0x1d2   :  { %v289_v38 = vadd.f32 %v521_v34, %v288_v37  ;;  %v298_v39 = vmul.f32 0.2, %v294_v36 }
 0x1d4   :  { %v297_v40 = vmul.f32 0.2, %v289_v38  ;;  %v300_v42 = vmax.f32 %v294_v36, %v298_v39 }
 0x1d6   :  { %v299_v41 = vmax.f32 %v289_v38, %v297_v40 }
 0x1d8   :  { %612 = vmatprep.mubr.msk.f32.mxu0 %vm215_vm1, %v299_v41 }
 0x1d9   :  { %613 = vmatmul.mubr.msk.f32.vlgmr.msra.gmra.mxu0 %vm215_vm1, %v300_v42 }
 0x299   :  { %v614_v49 = vpop.f32.mrf.mxu0 }
 0x29a   :  { %v394_v50 = vadd.f32 %v614_v49, %v524_v48 }
 0x29b   :  { %v388_v51 = vpop.f32.mrf.mxu0 }
 0x29c   :  { %v389_v52 = vadd.f32 %v524_v48, %v388_v51  ;;  %v398_v53 = vmul.f32 0.2, %v394_v50 }
 0x29e   :  { %v397_v54 = vmul.f32 0.2, %v389_v52  ;;  %v400_v56 = vmax.f32 %v394_v50, %v398_v53 }
 0x2a0   :  { %v399_v55 = vmax.f32 %v389_v52, %v397_v54 }
 0x2a2   :  { %631 = vmatprep.mubr.msk.f32.mxu1 %vm215_vm1, %v399_v55 }
 0x2a3   :  { %632 = vmatmul.mubr.msk.f32.vlgmr.msra.gmra.mxu1 %vm215_vm1, %v400_v56 }
 0x363   :  { %v633_v58 = vpop.f32.mrf.mxu1 }
 0x364   :  { %v494_v59 = vadd.f32 %v633_v58, %v527_v57 }
 0x365   :  { %v488_v60 = vpop.f32.mrf.mxu1 }
 0x366   :  { %498 = vst [vmem:[#allocation11 + $0x8] sm:$0xff] %v494_v59  ;;  %v489_v61 = vadd.f32 %v527_v57, %v488_v60 }
 0x368   :  { %497 = vst [vmem:[#allocation11] sm:$0xff] %v489_v61 }
 0x369   :  { %753 = shalt.err (!%p750_p1)
}
 0x36a   :  { %510 = dma.vmem_to_hbm [thread:$0]  %s505_s19, 256, %s893_s9, [#allocation4], %s772_s14, %s772_s14, %s773_s15  }
 0x36b   :  { %768 = dma.done.wait [#allocation4], 256  }
 0x36c   :  { %769 = vsyncadd [#allocation4], 4294967040 }
 0x36d   :  { %514 = vsyncpa [#allocation3], 1 }
 0x36e   :  { %515 = vsyncpa [#allocation6], 1 }
 0x36f   :  { %516 = vsyncpa [#allocation9], 1 }
 0x370   :  { %517 = vsyncpa [#allocation4], 1 }

</bundles_post_ra>
